<compile_context>
chip_gen: v7x
topology: tpu7x:2x2x1
jax: 0.10.0
libtpu: 0.0.40
codegen_flags: <defaults>
</compile_context>

<pallas_src>
import functools
import math

import jax
import jax.numpy as jnp
from jax import lax
from jax.experimental import pallas as pl
from jax.experimental.pallas import tpu as pltpu


def _vmem_capacity_bytes():
    """Physical VMEM of the local TPU (conservative default if unknown)."""
    try:
        info = pltpu.get_tpu_info()
        cap = getattr(info, "vmem_capacity_bytes", None)
        if cap:
            return int(cap)
    except Exception:
        pass
    return 64 * 1024 * 1024  # v7x has the smallest VMEM of current generations


def _pick_tile_rows(n_rows, n_classes, max_rows=1024):
    """Largest row block whose double-buffered input + f32 temps fit VMEM."""
    cap = _vmem_capacity_bytes()
    # Per block we need the (double-buffered) logits/target input plus a few
    # block-sized f32 element-wise intermediates (z, exp(z), smoothing
    # weights).  Budget ~6 block-sized live arrays against ~85% of VMEM.
    bytes_per_row = n_classes * 4 + 4
    budget_rows = int(cap * 0.85) // (6 * bytes_per_row)
    rows = max(8, min(max_rows, budget_rows))
    rows = (rows // 8) * 8
    n_rounded = ((n_rows + 7) // 8) * 8
    return max(8, min(rows, n_rounded))


def _smoothed_ce_kernel(x_ref, t_ref, sum_ref, cnt_ref, *,
                        label_smoothing, padding_idx, n_classes, n_rows):
    """One row-tile: fused log-softmax + smoothed-KL / NLL partial sums."""
    logits = x_ref[...].astype(jnp.float32)              # [TN, C]
    tgt = t_ref[...]                                      # [TN, 1] int32
    tn, C = logits.shape

    # Tail mask: rows >= n_rows are padding rows added by the wrapper.
    row0 = pl.program_id(0) * tn
    gidx = row0 + lax.broadcasted_iota(jnp.int32, (tn, 1), 0)
    in_range = gidx < n_rows

    # Fused log-softmax pieces: only 3 vocab-wide reductions, no [TN,C] logp.
    m = jnp.max(logits, axis=-1, keepdims=True)                   # reduction 1
    z = logits - m
    sumexp = jnp.sum(jnp.exp(z), axis=-1, keepdims=True)          # reduction 2
    lse = jnp.log(sumexp)                                         # logsumexp-m

    onehot = lax.broadcasted_iota(jnp.int32, (tn, C), 1) == tgt   # [TN, C]

    if label_smoothing < 1.0:
        fill = (1.0 - label_smoothing) / (n_classes - 1)
        # sum_c dist_c * log(dist_c) for a non-padded row (compile-time const).
        ent = 0.0
        if label_smoothing > 0.0:
            ent += label_smoothing * math.log(label_smoothing)
        if fill > 0.0:
            ent += (n_classes - 1) * fill * math.log(fill)
        # cross = sum_c dist_c * logp_c
        #       = sum_c [fill + (ls-fill)*onehot_c] * z_c  -  lse
        w = jnp.where(onehot, jnp.float32(label_smoothing), jnp.float32(fill))
        weighted = jnp.sum(w * z, axis=-1, keepdims=True)         # reduction 3
        cross = weighted - lse
        valid = (tgt != padding_idx) & in_range
        row_loss = jnp.where(valid, ent - cross, 0.0)
    else:
        z_t = jnp.sum(jnp.where(onehot, z, 0.0), axis=-1,
                      keepdims=True)                              # reduction 3
        nll = lse - z_t                                           # -log p(t)
        if padding_idx >= 0:
            valid = (tgt != padding_idx) & in_range
        else:
            valid = in_range
        row_loss = jnp.where(valid, nll, 0.0)

    tile_sum = jnp.sum(row_loss, axis=0, keepdims=True)                  # (1,1)
    tile_cnt = jnp.sum(valid.astype(jnp.float32), axis=0, keepdims=True)

    # Lane-dense per-tile output slots; broadcast the scalar across 128 lanes.
    sum_ref[...] = jnp.broadcast_to(tile_sum.reshape(1, 1, 1), sum_ref.shape)
    cnt_ref[...] = jnp.broadcast_to(tile_cnt.reshape(1, 1, 1), cnt_ref.shape)


def smoothed_cross_entropy_loss(predicted, target, *, ignore_index=-1,
                                label_smoothing=1.0, tile_rows=None):
    """predicted: [B, S, C] float logits; target: [B, S] int indices."""
    B, S, C = predicted.shape
    N = B * S
    x = predicted.reshape(N, C)
    t = target.reshape(N, 1).astype(jnp.int32)

    if tile_rows is None:
        tile_rows = _pick_tile_rows(N, C)
    assert tile_rows % 8 == 0 and tile_rows > 0

    num_tiles = (N + tile_rows - 1) // tile_rows
    n_pad = num_tiles * tile_rows
    if n_pad != N:
        # Padded rows are masked out inside the kernel via the row index.
        x = jnp.pad(x, ((0, n_pad - N), (0, 0)))
        t = jnp.pad(t, ((0, n_pad - N), (0, 0)))

    # TODO(synk): for very large vocab (C >= ~64K) add a second grid axis over
    # C with an online-softmax accumulator instead of keeping full C resident.

    kernel = functools.partial(
        _smoothed_ce_kernel,
        label_smoothing=float(label_smoothing),
        padding_idx=int(ignore_index),
        n_classes=C,
        n_rows=N,
    )

    # VMEM limit: double-buffered input block plus a few block-sized f32
    # intermediates, clamped below physical VMEM.
    itemsize = jnp.dtype(x.dtype).itemsize
    block_bytes = tile_rows * (C * max(itemsize, 4) + 4)
    cap = _vmem_capacity_bytes()
    vmem_limit = int(min(0.9 * cap,
                         max(32 * 1024 * 1024, 6 * block_bytes + (4 << 20))))

    part_sum, part_cnt = pl.pallas_call(
        kernel,
        out_shape=(
            jax.ShapeDtypeStruct((num_tiles, 1, 128), jnp.float32),
            jax.ShapeDtypeStruct((num_tiles, 1, 128), jnp.float32),
        ),
        grid_spec=pltpu.PrefetchScalarGridSpec(
            num_scalar_prefetch=0,
            grid=(num_tiles,),
            in_specs=[
                pl.BlockSpec((tile_rows, C), lambda i: (i, 0)),
                pl.BlockSpec((tile_rows, 1), lambda i: (i, 0)),
            ],
            out_specs=[
                pl.BlockSpec((1, 1, 128), lambda i: (i, 0, 0)),
                pl.BlockSpec((1, 1, 128), lambda i: (i, 0, 0)),
            ],
        ),
        compiler_params=pltpu.CompilerParams(
            dimension_semantics=("parallel",),
            vmem_limit_bytes=vmem_limit,
        ),
    )(x, t)

    total = jnp.sum(part_sum[:, 0, 0])
    if label_smoothing < 1.0:
        # KLDivLoss(reduction='batchmean') divides by N flattened rows.
        return total / jnp.float32(N)
    if ignore_index >= 0:
        # NOTE: an all-ignored batch divides by 0 -> NaN, same as PyTorch.
        return total / jnp.sum(part_cnt[:, 0, 0])
    return total / jnp.float32(N)


def _reference_loss(predicted, target, ignore_index, label_smoothing):
    """Pure-JAX reference mirroring the PyTorch forward."""
    B, S, C = predicted.shape
    x = predicted.reshape(-1, C).astype(jnp.float32)
    t = target.reshape(-1)
    N = x.shape[0]
    logp = jax.nn.log_softmax(x, axis=-1)
    if label_smoothing < 1.0:
        fill = (1.0 - label_smoothing) / (C - 1)
        dist = jnp.full((N, C), fill, jnp.float32)
        dist = dist.at[jnp.arange(N), t].set(label_smoothing)
        dist = jnp.where((t == ignore_index)[:, None], 0.0, dist)
        safe = jnp.where(dist > 0, dist, 1.0)
        kl = jnp.where(dist > 0, dist * (jnp.log(safe) - logp), 0.0)
        return jnp.sum(kl) / N                         # batchmean
    nll = -logp[jnp.arange(N), t]
    if ignore_index >= 0:
        valid = t != ignore_index
        return jnp.sum(jnp.where(valid, nll, 0.0)) / jnp.sum(valid)
    return jnp.mean(nll)


if __name__ == "__main__":
    key = jax.random.PRNGKey(0)
    B, S, C = 2, 8, 128          # batch, seq_len, vocab_size
    k1, k2 = jax.random.split(key)
    predicted = jax.random.normal(k1, (B, S, C), dtype=jnp.float32)
    target = jax.random.randint(k2, (B, S), 0, C, dtype=jnp.int32)
    target = target.at[0, 0].set(0).at[1, 3].set(0)    # padding positions

    # Case 1: label-smoothing branch (KLDivLoss batchmean), padding_idx = 0.
    loss_smooth = jax.block_until_ready(smoothed_cross_entropy_loss(
        predicted, target, ignore_index=0, label_smoothing=0.9))
    ref_smooth = _reference_loss(predicted, target, 0, 0.9)
    assert jnp.allclose(loss_smooth, ref_smooth, rtol=1e-5, atol=1e-5), (
        loss_smooth, ref_smooth)

    # Case 1b: same, forced multi-tile grid (exercises "parallel" partials).
    loss_smooth_t = jax.block_until_ready(smoothed_cross_entropy_loss(
        predicted, target, ignore_index=0, label_smoothing=0.9, tile_rows=8))
    assert jnp.allclose(loss_smooth_t, ref_smooth, rtol=1e-5, atol=1e-5), (
        loss_smooth_t, ref_smooth)

    # Case 2: default init (label_smoothing=1.0, ignore_index=-1) -> plain CE.
    loss_ce = jax.block_until_ready(smoothed_cross_entropy_loss(
        predicted, target, ignore_index=-1, label_smoothing=1.0))
    ref_ce = _reference_loss(predicted, target, -1, 1.0)
    assert jnp.allclose(loss_ce, ref_ce, rtol=1e-5, atol=1e-5), (loss_ce, ref_ce)

    # Case 3: CE with ignore_index, ragged N (tail-masked pad rows), 2 tiles.
    B2, S2, C2 = 3, 5, 200
    k3, k4 = jax.random.split(k1)
    pred2 = jax.random.normal(k3, (B2, S2, C2), dtype=jnp.float32)
    tgt2 = jax.random.randint(k4, (B2, S2), 0, C2, dtype=jnp.int32)
    tgt2 = tgt2.at[0, 1].set(7).at[2, 4].set(7)
    loss_ign = jax.block_until_ready(smoothed_cross_entropy_loss(
        pred2, tgt2, ignore_index=7, label_smoothing=1.0, tile_rows=8))
    ref_ign = _reference_loss(pred2, tgt2, 7, 1.0)
    assert jnp.allclose(loss_ign, ref_ign, rtol=1e-5, atol=1e-5), (
        loss_ign, ref_ign)

    print("KERNEL_OK")
</pallas_src>

<mosaic_0001>
module attributes {stable_mosaic.version = 11 : i64} {
  func.func @_smoothed_ce_kernel(%arg0: i32, %arg1: memref<16x128xf32, #tpu.memory_space<vmem>>, %arg2: memref<16x1xi32, #tpu.memory_space<vmem>>, %arg3: memref<1x1x128xf32, #tpu.memory_space<vmem>>, %arg4: memref<1x1x128xf32, #tpu.memory_space<vmem>>) attributes {dimension_semantics = [#tpu.dimension_semantics<parallel>], iteration_bounds = array<i64: 1>, scalar_prefetch = 0 : i64, scratch_operands = 0 : i64, tpu.core_type = #tpu.core_type<tc>, window_params = [{transform_indices = @transform_0, window_bounds = array<i64: 16, 128>}, {transform_indices = @transform_1, window_bounds = array<i64: 16, 1>}, {transform_indices = @transform_2, window_bounds = array<i64: 1, 1, 128>}, {transform_indices = @transform_3, window_bounds = array<i64: 1, 1, 128>}]} {
    %c0 = arith.constant 0 : index
    %c0_0 = arith.constant 0 : index
    %0 = vector.load %arg1[%c0, %c0_0] : memref<16x128xf32, #tpu.memory_space<vmem>>, vector<16x128xf32>
    %c0_1 = arith.constant 0 : index
    %c0_2 = arith.constant 0 : index
    %1 = vector.load %arg2[%c0_1, %c0_2] : memref<16x1xi32, #tpu.memory_space<vmem>>, vector<16x1xi32>
    %c16_i32 = arith.constant 16 : i32
    %2 = arith.muli %arg0, %c16_i32 : i32
    %3 = tpu.iota {dimensions = array<i32: 0>} : vector<16x1xi32>
    %4 = vector.broadcast %2 : i32 to vector<16x1xi32>
    %5 = arith.addi %4, %3 : vector<16x1xi32>
    %c16_i32_3 = arith.constant 16 : i32
    %6 = vector.broadcast %c16_i32_3 : i32 to vector<16x1xi32>
    %7 = arith.cmpi slt, %5, %6 : vector<16x1xi32>
    %cst = arith.constant dense<0xFF800000> : vector<16xf32>
    %8 = vector.multi_reduction <maximumf>, %0, %cst [1] : vector<16x128xf32> to vector<16xf32>
    %9 = vector.shape_cast %8 : vector<16xf32> to vector<16x1xf32>
    %10 = vector.broadcast %9 : vector<16x1xf32> to vector<16x128xf32>
    %11 = arith.subf %0, %10 : vector<16x128xf32>
    %12 = math.exp %11 : vector<16x128xf32>
    %cst_4 = arith.constant dense<0.000000e+00> : vector<16xf32>
    %13 = vector.multi_reduction <add>, %12, %cst_4 [1] : vector<16x128xf32> to vector<16xf32>
    %14 = vector.shape_cast %13 : vector<16xf32> to vector<16x1xf32>
    %15 = math.log %14 : vector<16x1xf32>
    %16 = tpu.iota {dimensions = array<i32: 1>} : vector<16x128xi32>
    %17 = vector.broadcast %1 : vector<16x1xi32> to vector<16x128xi32>
    %18 = arith.cmpi eq, %16, %17 : vector<16x128xi32>
    %cst_5 = arith.constant 0.899999976 : f32
    %cst_6 = arith.constant 7.87401571E-4 : f32
    %19 = vector.broadcast %cst_5 : f32 to vector<16x128xf32>
    %20 = vector.broadcast %cst_6 : f32 to vector<16x128xf32>
    %21 = arith.select %18, %19, %20 : vector<16x128xi1>, vector<16x128xf32>
    %22 = arith.mulf %21, %11 : vector<16x128xf32>
    %cst_7 = arith.constant dense<0.000000e+00> : vector<16xf32>
    %23 = vector.multi_reduction <add>, %22, %cst_7 [1] : vector<16x128xf32> to vector<16xf32>
    %24 = vector.shape_cast %23 : vector<16xf32> to vector<16x1xf32>
    %25 = arith.subf %24, %15 : vector<16x1xf32>
    %c0_i32 = arith.constant 0 : i32
    %26 = vector.broadcast %c0_i32 : i32 to vector<16x1xi32>
    %27 = arith.cmpi ne, %1, %26 : vector<16x1xi32>
    %28 = arith.andi %27, %7 : vector<16x1xi1>
    %cst_8 = arith.constant -0.809501707 : f32
    %29 = vector.broadcast %cst_8 : f32 to vector<16x1xf32>
    %30 = arith.subf %29, %25 : vector<16x1xf32>
    %cst_9 = arith.constant 0.000000e+00 : f32
    %31 = vector.broadcast %cst_9 : f32 to vector<16x1xf32>
    %32 = arith.select %28, %30, %31 : vector<16x1xi1>, vector<16x1xf32>
    %cst_10 = arith.constant dense<0.000000e+00> : vector<1xf32>
    %33 = vector.multi_reduction <add>, %32, %cst_10 [0] : vector<16x1xf32> to vector<1xf32>
    %34 = vector.shape_cast %33 : vector<1xf32> to vector<1x1xf32>
    %35 = arith.extui %28 : vector<16x1xi1> to vector<16x1xi32>
    %36 = arith.sitofp %35 : vector<16x1xi32> to vector<16x1xf32>
    %cst_11 = arith.constant dense<0.000000e+00> : vector<1xf32>
    %37 = vector.multi_reduction <add>, %36, %cst_11 [0] : vector<16x1xf32> to vector<1xf32>
    %38 = vector.shape_cast %37 : vector<1xf32> to vector<1x1xf32>
    %39 = vector.shape_cast %34 : vector<1x1xf32> to vector<1x1x1xf32>
    %40 = vector.shape_cast %39 : vector<1x1x1xf32> to vector<1x1x1xf32>
    %41 = vector.broadcast %40 : vector<1x1x1xf32> to vector<1x1x128xf32>
    %c0_12 = arith.constant 0 : index
    %c0_13 = arith.constant 0 : index
    %c0_14 = arith.constant 0 : index
    %42 = vector.load %arg3[%c0_12, %c0_13, %c0_14] : memref<1x1x128xf32, #tpu.memory_space<vmem>>, vector<1x1x128xf32>
    tpu.vector_store %arg3[%c0_12, %c0_13, %c0_14], %41 {strides = array<i32>} : memref<1x1x128xf32, #tpu.memory_space<vmem>>, vector<1x1x128xf32>,
    %43 = vector.shape_cast %38 : vector<1x1xf32> to vector<1x1x1xf32>
    %44 = vector.shape_cast %43 : vector<1x1x1xf32> to vector<1x1x1xf32>
    %45 = vector.broadcast %44 : vector<1x1x1xf32> to vector<1x1x128xf32>
    %c0_15 = arith.constant 0 : index
    %c0_16 = arith.constant 0 : index
    %c0_17 = arith.constant 0 : index
    %46 = vector.load %arg4[%c0_15, %c0_16, %c0_17] : memref<1x1x128xf32, #tpu.memory_space<vmem>>, vector<1x1x128xf32>
    tpu.vector_store %arg4[%c0_15, %c0_16, %c0_17], %45 {strides = array<i32>} : memref<1x1x128xf32, #tpu.memory_space<vmem>>, vector<1x1x128xf32>,
    return
  }
  func.func @transform_0(%arg0: i32) -> (i32, i32) {
    %c0_i32 = arith.constant 0 : i32
    %c0_i32_0 = arith.constant 0 : i32
    return %arg0, %c0_i32 : i32, i32
  }
  func.func @transform_1(%arg0: i32) -> (i32, i32) {
    %c0_i32 = arith.constant 0 : i32
    %c0_i32_0 = arith.constant 0 : i32
    return %arg0, %c0_i32 : i32, i32
  }
  func.func @transform_2(%arg0: i32) -> (i32, i32, i32) {
    %c0_i32 = arith.constant 0 : i32
    %c0_i32_0 = arith.constant 0 : i32
    %c0_i32_1 = arith.constant 0 : i32
    return %arg0, %c0_i32, %c0_i32_0 : i32, i32, i32
  }
  func.func @transform_3(%arg0: i32) -> (i32, i32, i32) {
    %c0_i32 = arith.constant 0 : i32
    %c0_i32_0 = arith.constant 0 : i32
    %c0_i32_1 = arith.constant 0 : i32
    return %arg0, %c0_i32, %c0_i32_0 : i32, i32, i32
  }
}

</mosaic_0001>

<bundles_post_ra>
// kernel: tpu_custom_call.1
= control target key start
LH: loop header
LB: loop body
LE: loop exit
PB: predicated region body
PF: predicated region fallthrough
CT: control target
= control target key end

     0   :  { %9 = vsyncpa [#allocation3], 0  ;;  %v202_v2 = vmov 0   ;;  %s277_s0 = inlined_call_operand.vmem [shape: f32[16,128], index: 0, kind: input, shape index: {}]   ;;  %s278_s1 = inlined_call_operand.vmem [shape: s32[16,1], index: 1, kind: input, shape index: {}]   ;;  %s279_s2 = inlined_call_operand.hbm [shape: f32[1,1,128], index: 2, kind: output, shape index: {0}]   ;;  %s280_s3 = inlined_call_operand.hbm [shape: f32[1,1,128], index: 3, kind: output, shape index: {1}]  }
   0x1   :  { %v15_v0 = vld [vmem:[%s277_s0] sm:$0xff]  ;;  %144 = vset.pattern.permute.xlu1 %v202_v2 }
   0x2   :  { %v233_v1 = vld [vmem:[%s278_s1] sm:$0xff]  ;;  %28 = vmax.xlane.f32.xlu0 %v15_v0 }
   0x3   :  { %10 = vsyncpa [#allocation5], 0  ;;  %v16_v3 = vld [vmem:[%s277_s0 + $0x8] sm:$0xff]  ;;  %49 = vperm.xlu1 %144, %v233_v1   ;;  %145 = vset.pattern.permute.xlu0 %v202_v2  ;;  %vm66_vm0 = vcmp.ne.s32.totalorder %v233_v1, 0  ;;  %vm74_vm2 = vcmask 7168   ;;  %v203_v7 = vmov 0.0   ;;  %v46_v11 = vlaneseq }
   0x4   :  { %v18_v4 = vld [vmem:[%s278_s1 + $0x8] sm:$0xff]  ;;  %v137_v8 = vsel %vm66_vm0, 1.0, %v203_v7  ;;  %v204_v23 = vmov 0.0007874016   ;;  %s205_s0 = smov [#allocation4]  }
   0x5   :  { %vm67_vm1 = vcmp.ne.s32.totalorder %v18_v4, 0  ;;  %v88_v14 = vsel %vm74_vm2, %v137_v8, 0.0  ;;  %v47_v18 = vand.u32 127, %v46_v11  ;;  %s125_s1 = sshll.u32 %s205_s0, 4  ;;  %s126_s1 = int_to_ptr.vmem [resolvable:$true] %s125_s1 }
   0x6   :  { %30 = vmax.xlane.f32.xlu0 %v16_v3  ;;  %v138_v9 = vsel %vm67_vm1, 1.0, %v203_v7  ;;  %s154_s20 = scalar_lea.vmem %s126_s1, 16  ;;  %s158_s21 = scalar_lea.vmem %s126_s1, 32 }
   0x7   :  { %52 = vperm.xlu1 %144, %v18_v4   ;;  %v89_v15 = vsel %vm74_vm2, %v138_v9, 0.0  ;;  %p155_p0 = scmp.ne.s32.totalorder %s126_s1, %s154_s20  ;;  %p159_p1 = scmp.lt.s32.totalorder %s126_s1, %s126_s1 }
   0x8   :  { %v90_v19 = vadd.f32 %v89_v15, %v88_v14  ;;  %p160_p2 = scmp.lt.s32.totalorder %s158_s21, %s154_s20 }
   0xa   :  { %v91_v20 = vrot.slane %v90_v19, 4  ;;  %p161_p3 = por %p160_p2, %p159_p1 }
   0xc   :  { %v92_v25 = vadd.f32 %v91_v20, %v90_v19  ;;  %p162_p4 = pnand %p161_p3, %p155_p0 }
   0xe   :  { %v93_v29 = vrot.slane %v92_v25, 2 }
  0x10   :  { %v94_v31 = vadd.f32 %v93_v29, %v92_v25 }
  0x12   :  { %v95_v32 = vrot.slane %v94_v31, 1 }
  0x14   :  { %v96_v33 = vadd.f32 %v95_v32, %v94_v31 }
  0x82   :  { %v50_v16 = vpop.permute.xlu1 %49 }
  0x83   :  { %vm54_vm3 = vcmp.eq.s32.totalorder %v47_v18, %v50_v16 }
  0x84   :  { %v56_v24 = vsel %vm54_vm3, 0.9, %v204_v23 }
  0x86   :  { %v53_v21 = vpop.permute.xlu1 %52 }
  0x87   :  { %vm55_vm4 = vcmp.eq.s32.totalorder %v47_v18, %v53_v21 }
  0x88   :  { %v57_v28 = vsel %vm55_vm4, 0.9, %v204_v23 }
  0x8f   :  { %v29_v5 = vpop.xlane.xlu0 %28 }
  0x90   :  { %v32_v6 = vsub.f32 %v15_v0, %v29_v5 }
  0x92   :  { %v34_v10 = vmul.f32 1.442695, %v32_v6  ;;  %v58_v26 = vmul.f32 %v56_v24, %v32_v6 }
  0x93   :  { %v31_v12 = vpop.xlane.xlu0 %30 }
  0x94   :  { %146 = vpow2.f32 %v34_v10  ;;  %v33_v13 = vsub.f32 %v16_v3, %v31_v12 }
  0x96   :  { %v36_v17 = vmul.f32 1.442695, %v33_v13  ;;  %v59_v30 = vmul.f32 %v57_v28, %v33_v13 }
  0x98   :  { %148 = vpow2.f32 %v36_v17 }
  0x9e   :  { %v147_v22 = vpop.eup %146 }
  0x9f   :  { %38 = vadd.xlane.f32.xlu0 %v147_v22 }
  0xa2   :  { %v149_v27 = vpop.eup %148 }
  0xa3   :  { %60 = vadd.xlane.f32.xlu0 %v58_v26  ;;  %40 = vadd.xlane.f32.xlu1 %v149_v27 }
  0xa7   :  { %62 = vadd.xlane.f32.xlu0 %v59_v30 }
  0xb4   :  { %105 = vperm.xlu1 %144, %v96_v33  }
 0x12c   :  { %v39_v34 = vpop.xlane.xlu0 %38 }
 0x12d   :  { %150 = vlog2.f32 %v39_v34 }
 0x130   :  { %v41_v35 = vpop.xlane.xlu1 %40  ;;  %v61_v38 = vpop.xlane.xlu0 %60 }
 0x131   :  { %152 = vlog2.f32 %v41_v35 }
 0x134   :  { %v106_v36 = vpop.permute.xlu1 %105  ;;  %v63_v44 = vpop.xlane.xlu0 %62 }
 0x135   :  { %108 = vst [vmem:[#allocation4] sm:$0x1] %v106_v36 }
 0x137   :  { %v151_v37 = vpop.eup %150 }
 0x138   :  { %v43_v39 = vmul.f32 0.6931472, %v151_v37 }
 0x13a   :  { %v64_v40 = vsub.f32 %v61_v38, %v43_v39 }
 0x13b   :  { %v153_v41 = vpop.eup %152 }
 0x13c   :  { %v70_v42 = vsub.f32 -0.8095017, %v64_v40  ;;  %v45_v43 = vmul.f32 0.6931472, %v153_v41 }
 0x13e   :  { %v65_v45 = vsub.f32 %v63_v44, %v45_v43  ;;  %v72_v46 = vsel %vm66_vm0, %v70_v42, 0.0 }
 0x13f   :  { %v75_v49 = vsel %vm74_vm2, %v72_v46, 0.0 }
 0x140   :  { %v71_v47 = vsub.f32 -0.8095017, %v65_v45 }
 0x142   :  { %v73_v48 = vsel %vm67_vm1, %v71_v47, 0.0 }
 0x143   :  { %v76_v50 = vsel %vm74_vm2, %v73_v48, 0.0 }
 0x144   :  { %v77_v51 = vadd.f32 %v76_v50, %v75_v49 }
 0x146   :  { %v78_v52 = vrot.slane %v77_v51, 4 }
 0x148   :  { %v79_v53 = vadd.f32 %v78_v52, %v77_v51 }
 0x14a   :  { %v80_v54 = vrot.slane %v79_v53, 2 }
 0x14c   :  { %v81_v55 = vadd.f32 %v80_v54, %v79_v53 }
 0x14e   :  { %v82_v56 = vrot.slane %v81_v55, 1 }
 0x150   :  { %v83_v57 = vadd.f32 %v82_v56, %v81_v55 }
 0x152   :  { %99 = vperm.xlu0 %145, %v83_v57  }
 0x153   :  { %165 = shalt.err (!%p162_p4)
}
 0x154   :  { %s166_s24 = scalar_lea.hbm %s280_s3, 16 }
 0x155   :  { %p167_p5 = scmp.ne.s32.totalorder %s280_s3, %s166_s24  ;;  %p170_p6 = scmp.lt.u32.totalorder %s166_s24, %s280_s3 }
 0x157   :  { %p172_p7 = pnand %p170_p6, %p167_p5 }
 0x159   :  { %175 = shalt.err (!%p172_p7)
}
 0x15a   :  { %128 = dma.vmem_to_hbm [thread:$0]  %s126_s1, 16, %s280_s3, [#allocation5]  }
 0x15b   :  { %s206_s4 = smov [#allocation2]  }
 0x15c   :  { %s115_s5 = sshll.u32 %s206_s4, 4  ;;  %s116_s5 = int_to_ptr.vmem [resolvable:$true] %s115_s5 }
 0x15d   :  { %s176_s6 = scalar_lea.vmem %s116_s5, 16  ;;  %s180_s7 = scalar_lea.vmem %s116_s5, 32 }
 0x15e   :  { %p177_p8 = scmp.ne.s32.totalorder %s116_s5, %s176_s6  ;;  %p181_p9 = scmp.lt.s32.totalorder %s116_s5, %s116_s5 }
 0x15f   :  { %p182_p10 = scmp.lt.s32.totalorder %s180_s7, %s176_s6 }
 0x161   :  { %p183_p11 = por %p182_p10, %p181_p9 }
 0x163   :  { %p184_p12 = pnand %p183_p11, %p177_p8 }
 0x1d1   :  { %v100_v58 = vpop.permute.xlu0 %99 }
 0x1d2   :  { %102 = vst [vmem:[#allocation2] sm:$0x1] %v100_v58 }
 0x1d3   :  { %187 = shalt.err (!%p184_p12)
}
 0x1d4   :  { %s188_s10 = scalar_lea.hbm %s279_s2, 16 }
 0x1d5   :  { %p189_p13 = scmp.ne.s32.totalorder %s279_s2, %s188_s10  ;;  %p192_p0 = scmp.lt.u32.totalorder %s188_s10, %s279_s2 }
 0x1d7   :  { %p194_p1 = pnand %p192_p0, %p189_p13 }
 0x1d9   :  { %197 = shalt.err (!%p194_p1)
}
 0x1da   :  { %118 = dma.vmem_to_hbm [thread:$0]  %s116_s5, 16, %s279_s2, [#allocation3]  }
 0x1db   :  { %198 = dma.done.wait [#allocation3], 16  }
 0x1dc   :  { %199 = vsyncadd [#allocation3], 4294967280 }
 0x1dd   :  { %200 = dma.done.wait [#allocation5], 16  }
 0x1de   :  { %201 = vsyncadd [#allocation5], 4294967280 }
 0x1df   :  { %135 = vsyncpa [#allocation3], 1 }
 0x1e0   :  { %136 = vsyncpa [#allocation5], 1 }

</bundles_post_ra>
